<compile_context>
chip_gen: v7x
topology: tpu7x:2x2x1
jax: 0.10.0
libtpu: 0.0.40
codegen_flags: <defaults>
</compile_context>

<pallas_src>
import functools

import jax
import jax.numpy as jnp
from jax import lax
from jax.experimental import pallas as pl
from jax.experimental.pallas import tpu as pltpu

LANES = 128


def _round_up(x, m):
    return (x + m - 1) // m * m


# ----------------------------------------------------------------------------
# Kernel
# ----------------------------------------------------------------------------
def actor_critic_kernel(state_ref, w_ref, b_ref, out_ref, *, s_rows, a_dim, v_col):
    s = state_ref[...]                                   # [TB, S_pad] f32

    # Static slices of the packed parameter slabs (sublane offsets are
    # multiples of 8, so no tile-boundary crossing).
    w1 = w_ref[0:s_rows, :]                              # [S_pad, 128]
    w2 = w_ref[s_rows:s_rows + LANES, :]                 # [128, 128]
    w3 = w_ref[s_rows + LANES:s_rows + 2 * LANES, :]     # [128, 128]
    b1 = b_ref[0:1, :]
    b2 = b_ref[1:2, :]
    b3 = b_ref[2:3, :]
    va = b_ref[3:4, :]                                   # collapsed-critic v_a row

    # Actor stage 1 (lane v_col additionally carries  state @ v_s + c0).
    y1 = jnp.dot(s, w1, preferred_element_type=jnp.float32) + b1
    x1 = jnp.maximum(y1, 0.0)
    # Actor stage 2.
    y2 = jnp.dot(x1, w2, preferred_element_type=jnp.float32) + b2
    x2 = jnp.maximum(y2, 0.0)
    # Actor stage 3: logits, then ReLU (as in the PyTorch model).
    y3 = jnp.dot(x2, w3, preferred_element_type=jnp.float32) + b3
    logits = jnp.maximum(y3, 0.0)

    # Masked softmax over the first a_dim lanes; padding lanes become exactly 0.
    lane = lax.broadcasted_iota(jnp.int32, logits.shape, 1)
    masked = jnp.where(lane < a_dim, logits, jnp.float32(-1e30))
    m = jnp.max(masked, axis=-1, keepdims=True)
    e = jnp.exp(masked - m)
    denom = jnp.sum(e, axis=-1, keepdims=True)
    action = e * pl.reciprocal(denom, approx=True)       # [TB, 128]

    # Collapsed critic: value = (s @ v_s + c0) + action @ v_a.
    # The first term sits (un-ReLU'd) in y1 lane v_col; the second is a VPU
    # multiply + lane reduction (padded action lanes are 0, so no masking).
    av = jnp.sum(action * va, axis=-1, keepdims=True)    # [TB, 1]
    value_vec = y1 + av                                  # lane v_col holds value

    # One unmasked, lane-dense 128-wide store.
    out_ref[...] = jnp.where(lane == v_col, value_vec, action)


# ----------------------------------------------------------------------------
# Parameter packing (pure JAX, done once in the wrapper)
# ----------------------------------------------------------------------------
def pack_params(p):
    S = p["w_in"].shape[0]
    A = p["w_f2"].shape[1]
    s_pad = _round_up(S, 8)
    v_col = max(s_pad, A)
    assert v_col < LANES and A <= LANES and S <= LANES

    # Collapse the (purely linear) critic:  value = s @ v_s + action @ v_a + c0.
    v_s = p["ws"] @ p["wc1_s"] @ p["wo"]                      # [S, 1]
    v_a = p["wa"] @ p["wc1_a"] @ p["wo"]                      # [A, 1]
    c0 = (p["bs"] @ p["wc1_s"] @ p["wo"]
          + p["ba"] @ p["wc1_a"] @ p["wo"]
          + p["bc1"] @ p["wo"] + p["bo"])                     # [1, 1]

    w_pack = jnp.zeros((s_pad + 2 * LANES, LANES), jnp.float32)
    w_pack = w_pack.at[0:S, 0:S].set(p["w_in"])
    w_pack = w_pack.at[0:S, v_col:v_col + 1].set(v_s)
    w_pack = w_pack.at[s_pad:s_pad + S, 0:S].set(p["w_f1"])
    w_pack = w_pack.at[s_pad + LANES:s_pad + LANES + S, 0:A].set(p["w_f2"])

    b_pack = jnp.zeros((8, LANES), jnp.float32)
    b_pack = b_pack.at[0:1, 0:S].set(p["b_in"])
    b_pack = b_pack.at[0:1, v_col:v_col + 1].set(c0)
    b_pack = b_pack.at[1:2, 0:S].set(p["b_f1"])
    b_pack = b_pack.at[2:3, 0:A].set(p["b_f2"])
    b_pack = b_pack.at[3:4, 0:A].set(v_a.T)

    return w_pack, b_pack, S, A, s_pad, v_col


# ----------------------------------------------------------------------------
# Wrapper
# ----------------------------------------------------------------------------
def actor_critic_forward(state, params, *, block_b=None):
    w_pack, b_pack, S, A, s_pad, v_col = pack_params(params)
    B = state.shape[0]
    if block_b is None:
        block_b = min(512, _round_up(B, 8))   # well inside v7x's 64 MiB VMEM
    b_padded = _round_up(B, block_b)

    state_p = jnp.zeros((b_padded, s_pad), jnp.float32)
    state_p = state_p.at[:B, :S].set(state.astype(jnp.float32))

    kernel = functools.partial(
        actor_critic_kernel, s_rows=s_pad, a_dim=A, v_col=v_col)

    out = pl.pallas_call(
        kernel,
        out_shape=jax.ShapeDtypeStruct((b_padded, LANES), jnp.float32),
        grid=(b_padded // block_b,),
        in_specs=[
            pl.BlockSpec((block_b, s_pad), lambda i: (i, 0)),            # state tile
            pl.BlockSpec((s_pad + 2 * LANES, LANES), lambda i: (0, 0)),  # weights (resident)
            pl.BlockSpec((8, LANES), lambda i: (0, 0)),                  # biases  (resident)
        ],
        out_specs=pl.BlockSpec((block_b, LANES), lambda i: (i, 0)),
        compiler_params=pltpu.CompilerParams(
            dimension_semantics=("parallel",),
            vmem_limit_bytes=32 * 1024 * 1024,
        ),
    )(state_p, w_pack, b_pack)

    action = out[:B, :A]
    value = out[:B, v_col:v_col + 1]
    return action, value


# ----------------------------------------------------------------------------
# Synthetic parameters + pure-JAX reference (original layer-by-layer semantics)
# ----------------------------------------------------------------------------
def init_params(key, state_dim, action_dim, hidden_dim):
    """Deterministic synthetic parameters.  Weights stored as [in, out]."""
    ks = jax.random.split(key, 16)

    def w(k, shape, scale=0.1):
        return (scale * jax.random.normal(k, shape)).astype(jnp.float32)

    return {
        # Actor
        "w_in": w(ks[0], (state_dim, state_dim)),
        "b_in": w(ks[1], (1, state_dim)),
        "w_f1": w(ks[2], (state_dim, state_dim)),
        "b_f1": w(ks[3], (1, state_dim)),
        "w_f2": w(ks[4], (state_dim, action_dim)),
        "b_f2": w(ks[5], (1, action_dim)),
        # Critic
        "ws": w(ks[6], (state_dim, state_dim)),
        "bs": w(ks[7], (1, state_dim)),
        "wa": w(ks[8], (action_dim, action_dim)),
        "ba": w(ks[9], (1, action_dim)),
        "wc1_s": w(ks[10], (state_dim, hidden_dim)),
        "wc1_a": w(ks[11], (action_dim, hidden_dim)),
        "bc1": w(ks[12], (1, hidden_dim)),
        "wo": w(ks[13], (hidden_dim, 1)),
        "bo": w(ks[14], (1, 1)),
    }


def reference_forward(state, p):
    x = jnp.maximum(state @ p["w_in"] + p["b_in"], 0.0)
    x = jnp.maximum(x @ p["w_f1"] + p["b_f1"], 0.0)
    logits = jnp.maximum(x @ p["w_f2"] + p["b_f2"], 0.0)
    action = jax.nn.softmax(logits, axis=-1)
    so = state @ p["ws"] + p["bs"]
    ao = action @ p["wa"] + p["ba"]
    h = jnp.concatenate([so, ao], axis=-1) @ jnp.concatenate(
        [p["wc1_s"], p["wc1_a"]], axis=0) + p["bc1"]
    value = h @ p["wo"] + p["bo"]
    return action, value


if __name__ == "__main__":
    state_dim, action_dim, hidden_dim = 32, 16, 32
    batch = 8

    key = jax.random.PRNGKey(0)
    k_state, k_params = jax.random.split(key)
    state = jax.random.normal(k_state, (batch, state_dim), dtype=jnp.float32)
    params = init_params(k_params, state_dim, action_dim, hidden_dim)

    action, value = actor_critic_forward(state, params)
    action = jax.block_until_ready(action)
    value = jax.block_until_ready(value)

    # Sanity check against the layer-by-layer pure-JAX reference.  Tolerance
    # is loose enough for the approx EUP reciprocal and the algebraic collapse.
    ref_action, ref_value = reference_forward(state, params)
    assert action.shape == (batch, action_dim)
    assert value.shape == (batch, 1)
    assert jnp.allclose(action, ref_action, atol=2e-3, rtol=2e-3)
    assert jnp.allclose(value, ref_value, atol=2e-3, rtol=2e-3)

    print("KERNEL_OK")
</pallas_src>

<mosaic_0001>
module attributes {stable_mosaic.version = 11 : i64} {
  func.func @actor_critic_kernel(%arg0: i32, %arg1: memref<8x32xf32, #tpu.memory_space<vmem>>, %arg2: memref<288x128xf32, #tpu.memory_space<vmem>>, %arg3: memref<8x128xf32, #tpu.memory_space<vmem>>, %arg4: memref<8x128xf32, #tpu.memory_space<vmem>>) attributes {dimension_semantics = [#tpu.dimension_semantics<parallel>], iteration_bounds = array<i64: 1>, scalar_prefetch = 0 : i64, scratch_operands = 0 : i64, tpu.core_type = #tpu.core_type<tc>, window_params = [{transform_indices = @transform_0, window_bounds = array<i64: 8, 32>}, {pipeline_mode = #tpu.pipeline_mode<synchronous>, transform_indices = @transform_1, window_bounds = array<i64: 288, 128>}, {pipeline_mode = #tpu.pipeline_mode<synchronous>, transform_indices = @transform_2, window_bounds = array<i64: 8, 128>}, {transform_indices = @transform_3, window_bounds = array<i64: 8, 128>}]} {
    %c0 = arith.constant 0 : index
    %c0_0 = arith.constant 0 : index
    %0 = vector.load %arg1[%c0, %c0_0] : memref<8x32xf32, #tpu.memory_space<vmem>>, vector<8x32xf32>
    %c0_1 = arith.constant 0 : index
    %c0_2 = arith.constant 0 : index
    %1 = vector.load %arg2[%c0_1, %c0_2] : memref<288x128xf32, #tpu.memory_space<vmem>>, vector<32x128xf32>
    %c32 = arith.constant 32 : index
    %c0_3 = arith.constant 0 : index
    %2 = vector.load %arg2[%c32, %c0_3] : memref<288x128xf32, #tpu.memory_space<vmem>>, vector<128x128xf32>
    %c160 = arith.constant 160 : index
    %c0_4 = arith.constant 0 : index
    %3 = vector.load %arg2[%c160, %c0_4] : memref<288x128xf32, #tpu.memory_space<vmem>>, vector<128x128xf32>
    %c0_5 = arith.constant 0 : index
    %c0_6 = arith.constant 0 : index
    %4 = vector.load %arg3[%c0_5, %c0_6] : memref<8x128xf32, #tpu.memory_space<vmem>>, vector<1x128xf32>
    %c1 = arith.constant 1 : index
    %c0_7 = arith.constant 0 : index
    %5 = vector.load %arg3[%c1, %c0_7] : memref<8x128xf32, #tpu.memory_space<vmem>>, vector<1x128xf32>
    %c2 = arith.constant 2 : index
    %c0_8 = arith.constant 0 : index
    %6 = vector.load %arg3[%c2, %c0_8] : memref<8x128xf32, #tpu.memory_space<vmem>>, vector<1x128xf32>
    %c3 = arith.constant 3 : index
    %c0_9 = arith.constant 0 : index
    %7 = vector.load %arg3[%c3, %c0_9] : memref<8x128xf32, #tpu.memory_space<vmem>>, vector<1x128xf32>
    %cst = arith.constant dense<0.000000e+00> : vector<8x128xf32>
    %8 = tpu.matmul %0, %1, %cst {dimension_numbers = #tpu.dot_dimension_numbers<[1], [0], [0], [1], [0, 0, 1, 1], [], []>} : vector<8x32xf32>, vector<32x128xf32>, vector<8x128xf32> -> vector<8x128xf32>
    %9 = vector.broadcast %4 : vector<1x128xf32> to vector<8x128xf32>
    %10 = arith.addf %8, %9 : vector<8x128xf32>
    %cst_10 = arith.constant 0.000000e+00 : f32
    %11 = vector.broadcast %cst_10 : f32 to vector<8x128xf32>
    %12 = arith.maximumf %10, %11 : vector<8x128xf32>
    %cst_11 = arith.constant dense<0.000000e+00> : vector<8x128xf32>
    %13 = tpu.matmul %12, %2, %cst_11 {dimension_numbers = #tpu.dot_dimension_numbers<[1], [0], [0], [1], [0, 0, 1, 1], [], []>} : vector<8x128xf32>, vector<128x128xf32>, vector<8x128xf32> -> vector<8x128xf32>
    %14 = vector.broadcast %5 : vector<1x128xf32> to vector<8x128xf32>
    %15 = arith.addf %13, %14 : vector<8x128xf32>
    %cst_12 = arith.constant 0.000000e+00 : f32
    %16 = vector.broadcast %cst_12 : f32 to vector<8x128xf32>
    %17 = arith.maximumf %15, %16 : vector<8x128xf32>
    %cst_13 = arith.constant dense<0.000000e+00> : vector<8x128xf32>
    %18 = tpu.matmul %17, %3, %cst_13 {dimension_numbers = #tpu.dot_dimension_numbers<[1], [0], [0], [1], [0, 0, 1, 1], [], []>} : vector<8x128xf32>, vector<128x128xf32>, vector<8x128xf32> -> vector<8x128xf32>
    %19 = vector.broadcast %6 : vector<1x128xf32> to vector<8x128xf32>
    %20 = arith.addf %18, %19 : vector<8x128xf32>
    %cst_14 = arith.constant 0.000000e+00 : f32
    %21 = vector.broadcast %cst_14 : f32 to vector<8x128xf32>
    %22 = arith.maximumf %20, %21 : vector<8x128xf32>
    %23 = tpu.iota {dimensions = array<i32: 1>} : vector<8x128xi32>
    %c16_i32 = arith.constant 16 : i32
    %24 = vector.broadcast %c16_i32 : i32 to vector<8x128xi32>
    %25 = arith.cmpi slt, %23, %24 : vector<8x128xi32>
    %cst_15 = arith.constant -1.000000e+30 : f32
    %26 = vector.broadcast %cst_15 : f32 to vector<8x128xf32>
    %27 = arith.select %25, %22, %26 : vector<8x128xi1>, vector<8x128xf32>
    %cst_16 = arith.constant dense<0xFF800000> : vector<8xf32>
    %28 = vector.multi_reduction <maximumf>, %27, %cst_16 [1] : vector<8x128xf32> to vector<8xf32>
    %29 = vector.shape_cast %28 : vector<8xf32> to vector<8x1xf32>
    %30 = vector.broadcast %29 : vector<8x1xf32> to vector<8x128xf32>
    %31 = arith.subf %27, %30 : vector<8x128xf32>
    %32 = math.exp %31 : vector<8x128xf32>
    %cst_17 = arith.constant dense<0.000000e+00> : vector<8xf32>
    %33 = vector.multi_reduction <add>, %32, %cst_17 [1] : vector<8x128xf32> to vector<8xf32>
    %34 = vector.shape_cast %33 : vector<8xf32> to vector<8x1xf32>
    %35 = tpu.reciprocal %34 {approx = true} : vector<8x1xf32> -> vector<8x1xf32>
    %36 = vector.broadcast %35 : vector<8x1xf32> to vector<8x128xf32>
    %37 = arith.mulf %32, %36 : vector<8x128xf32>
    %38 = vector.broadcast %7 : vector<1x128xf32> to vector<8x128xf32>
    %39 = arith.mulf %37, %38 : vector<8x128xf32>
    %cst_18 = arith.constant dense<0.000000e+00> : vector<8xf32>
    %40 = vector.multi_reduction <add>, %39, %cst_18 [1] : vector<8x128xf32> to vector<8xf32>
    %41 = vector.shape_cast %40 : vector<8xf32> to vector<8x1xf32>
    %42 = vector.broadcast %41 : vector<8x1xf32> to vector<8x128xf32>
    %43 = arith.addf %10, %42 : vector<8x128xf32>
    %c32_i32 = arith.constant 32 : i32
    %44 = vector.broadcast %c32_i32 : i32 to vector<8x128xi32>
    %45 = arith.cmpi eq, %23, %44 : vector<8x128xi32>
    %46 = arith.select %45, %43, %37 : vector<8x128xi1>, vector<8x128xf32>
    %c0_19 = arith.constant 0 : index
    %c0_20 = arith.constant 0 : index
    %47 = vector.load %arg4[%c0_19, %c0_20] : memref<8x128xf32, #tpu.memory_space<vmem>>, vector<8x128xf32>
    tpu.vector_store %arg4[%c0_19, %c0_20], %46 {strides = array<i32>} : memref<8x128xf32, #tpu.memory_space<vmem>>, vector<8x128xf32>,
    return
  }
  func.func @transform_0(%arg0: i32) -> (i32, i32) {
    %c0_i32 = arith.constant 0 : i32
    %c0_i32_0 = arith.constant 0 : i32
    return %arg0, %c0_i32 : i32, i32
  }
  func.func @transform_1(%arg0: i32) -> (i32, i32) {
    %c0_i32 = arith.constant 0 : i32
    %c0_i32_0 = arith.constant 0 : i32
    %c0_i32_1 = arith.constant 0 : i32
    return %c0_i32, %c0_i32_0 : i32, i32
  }
  func.func @transform_2(%arg0: i32) -> (i32, i32) {
    %c0_i32 = arith.constant 0 : i32
    %c0_i32_0 = arith.constant 0 : i32
    %c0_i32_1 = arith.constant 0 : i32
    return %c0_i32, %c0_i32_0 : i32, i32
  }
  func.func @transform_3(%arg0: i32) -> (i32, i32) {
    %c0_i32 = arith.constant 0 : i32
    %c0_i32_0 = arith.constant 0 : i32
    return %arg0, %c0_i32 : i32, i32
  }
}

</mosaic_0001>

<bundles_post_ra>
// kernel: tpu_custom_call.1
= control target key start
LH: loop header
LB: loop body
LE: loop exit
PB: predicated region body
PF: predicated region fallthrough
CT: control target
= control target key end

     0   :  { %8 = vsyncpa [#allocation3], 0  ;;  %s746_s0 = inlined_call_operand.hbm [shape: f32[8,32], index: 0, kind: input, shape index: {}]   ;;  %s747_s1 = inlined_call_operand.hbm [shape: f32[288,128], index: 1, kind: input, shape index: {}]   ;;  %s748_s2 = inlined_call_operand.hbm [shape: f32[8,128], index: 2, kind: input, shape index: {}]   ;;  %s749_s3 = inlined_call_operand.hbm [shape: f32[8,128], index: 3, kind: output, shape index: {}]  }
   0x1   :  { %9 = vsyncpa [#allocation6], 0 }
   0x2   :  { %10 = vsyncpa [#allocation4], 0  ;;  %s648_s12 = smov [#allocation5]   ;;  %s554_s16 = scalar_lea.hbm %s747_s1, 4608 }
   0x3   :  { %s26_s13 = sshll.u32 %s648_s12, 4  ;;  %p555_p0 = scmp.ne.s32.totalorder %s747_s1, %s554_s16  ;;  %s27_s13 = int_to_ptr.vmem [resolvable:$true] %s26_s13 }
   0x4   :  { %p558_p1 = scmp.lt.u32.totalorder %s554_s16, %s747_s1 }
   0x6   :  { %p560_p2 = pnand %p558_p1, %p555_p0 }
   0x8   :  { %563 = shalt.err (!%p560_p2)
}
   0x9   :  { %s564_s21 = scalar_lea.vmem %s27_s13, 4608  ;;  %p569_p4 = scmp.lt.s32.totalorder %s27_s13, %s27_s13 }
   0xa   :  { %p565_p3 = scmp.ne.s32.totalorder %s27_s13, %s564_s21  ;;  %p570_p5 = scmp.lt.s32.totalorder %s564_s21, %s564_s21 }
   0xc   :  { %p571_p6 = por %p570_p5, %p569_p4 }
   0xe   :  { %p572_p7 = pnand %p571_p6, %p565_p3 }
  0x10   :  { %575 = shalt.err (!%p572_p7)
}
  0x11   :  { %s649_s22 = smov 128   ;;  %s650_s23 = smov 8  }
  0x12   :  { %32 = dma.hbm_to_vmem [thread:$0]  %s747_s1, 4608, %s27_s13, [#allocation6], %s649_s22, %s649_s22, %s650_s23  }
  0x13   :  { %s651_s26 = smov [#allocation2]   ;;  %s652_s28 = smov [#allocation7]  }
  0x14   :  { %s17_s27 = sshll.u32 %s651_s26, 4  ;;  %s39_s29 = sshll.u32 %s652_s28, 4  ;;  %s18_s27 = int_to_ptr.vmem [resolvable:$true] %s17_s27  ;;  %s40_s29 = int_to_ptr.vmem [resolvable:$true] %s39_s29 }
  0x15   :  { %s576_s5 = scalar_lea.hbm %s746_s0, 128 }
  0x16   :  { %p577_p8 = scmp.ne.s32.totalorder %s746_s0, %s576_s5  ;;  %p580_p9 = scmp.lt.u32.totalorder %s576_s5, %s746_s0 }
  0x18   :  { %p582_p10 = pnand %p580_p9, %p577_p8 }
  0x1a   :  { %585 = shalt.err (!%p582_p10)
}
  0x1b   :  { %s586_s1 = scalar_lea.vmem %s18_s27, 128  ;;  %p591_p12 = scmp.lt.s32.totalorder %s18_s27, %s18_s27 }
  0x1c   :  { %p587_p11 = scmp.ne.s32.totalorder %s18_s27, %s586_s1  ;;  %p592_p13 = scmp.lt.s32.totalorder %s586_s1, %s586_s1 }
  0x1e   :  { %p593_p0 = por %p592_p13, %p591_p12 }
  0x20   :  { %p594_p1 = pnand %p593_p0, %p587_p11 }
  0x22   :  { %597 = shalt.err (!%p594_p1)
}
  0x23   :  { %20 = dma.hbm_to_vmem [thread:$0]  %s746_s0, 128, %s18_s27, [#allocation3]  }
  0x24   :  { %s598_s14 = scalar_lea.hbm %s748_s2, 128 }
  0x25   :  { %p599_p2 = scmp.ne.s32.totalorder %s748_s2, %s598_s14  ;;  %p602_p3 = scmp.lt.u32.totalorder %s598_s14, %s748_s2 }
  0x27   :  { %p604_p4 = pnand %p602_p3, %p599_p2 }
  0x29   :  { %607 = shalt.err (!%p604_p4)
}
  0x2a   :  { %s608_s19 = scalar_lea.vmem %s40_s29, 128  ;;  %p613_p6 = scmp.lt.s32.totalorder %s40_s29, %s40_s29 }
  0x2b   :  { %p609_p5 = scmp.ne.s32.totalorder %s40_s29, %s608_s19  ;;  %p614_p7 = scmp.lt.s32.totalorder %s608_s19, %s608_s19 }
  0x2d   :  { %p615_p8 = por %p614_p7, %p613_p6 }
  0x2f   :  { %p616_p9 = pnand %p615_p8, %p609_p5 }
  0x31   :  { %619 = shalt.err (!%p616_p9)
}
  0x32   :  { %42 = dma.hbm_to_vmem [thread:$0]  %s748_s2, 128, %s40_s29, [#allocation6]  }
  0x33   :  { %642 = dma.done.wait [#allocation3], 128  }
  0x34   :  { %643 = vsyncadd [#allocation3], 4294967168 }
  0x35   :  { %644 = dma.done.wait [#allocation6], 4736  }
  0x36   :  { %645 = vsyncadd [#allocation6], 4294962560  ;;  %v653_v0 = vmov 0.0|0.0   ;;  %vm654_vm0 = vmmov 0   ;;  %v655_v1 = vmov 0.0   ;;  %v53_v2 = vld [vmem:[#allocation5] sm:$0xff] }
  0x37   :  { %487 = vmatprep.subr.bf16.mxu0 %v653_v0  ;;  %414 = vmatprep.mubr.msk.f32.mxu0 %vm654_vm0, %v655_v1  ;;  %v54_v3 = vld [vmem:[#allocation5 + $0x8] sm:$0xff]  ;;  %v55_v4 = vld [vmem:[#allocation5 + $0x10] sm:$0xff]  ;;  %v56_v6 = vld [vmem:[#allocation5 + $0x18] sm:$0xff]  ;;  %vm97_vm1 = vcmask 261120   ;;  %s656_s2 = smov [#allocation8]  }
  0x38   :  { %493 = vmatprep.subr.bf16.mxu1 %v653_v0  ;;  %449 = vmatprep.mubr.msk.f32.mxu1 %vm654_vm0, %v655_v1  ;;  %v488_v5 = vpack.c.bf16 %v54_v3, %v53_v2  ;;  %v57_v7 = vld [vmem:[#allocation5 + $0x20] sm:$0xff]  ;;  %v58_v8 = vld [vmem:[#allocation5 + $0x28] sm:$0xff]  ;;  %v59_v9 = vld [vmem:[#allocation5 + $0x30] sm:$0xff]  ;;  %v491_v11 = vpack.c.bf16 %v56_v6, %v55_v4  ;;  %v322_v4 = vlaneseq  ;;  %s352_s21 = sshll.u32 %s656_s2, 4  ;;  %s353_s21 = int_to_ptr.vmem [resolvable:$true] %s352_s21 }
  0x39   :  { %v60_v10 = vld [vmem:[#allocation5 + $0x38] sm:$0xff]  ;;  %v494_v12 = vpack.c.bf16 %v58_v8, %v57_v7  ;;  %v61_v14 = vld [vmem:[#allocation5 + $0x40] sm:$0xff]  ;;  %v62_v15 = vld [vmem:[#allocation5 + $0x48] sm:$0xff]  ;;  %s620_s22 = scalar_lea.vmem %s353_s21, 128  ;;  %p625_p11 = scmp.lt.s32.totalorder %s353_s21, %s353_s21 }
  0x3a   :  { %489 = vmatpush3.bf16.msra.mxu0 %v488_v5  ;;  %v497_v13 = vpack.c.bf16 %v60_v10, %v59_v9  ;;  %v52_v16 = vld [vmem:[#allocation2] sm:$0xff]  ;;  %v500_v17 = vpack.c.bf16 %v62_v15, %v61_v14  ;;  %v63_v18 = vld [vmem:[#allocation5 + $0x50] sm:$0xff]  ;;  %v65_v21 = vld [vmem:[#allocation5 + $0x60] sm:$0xff]  ;;  %v323_v6 = vand.u32 127, %v322_v4  ;;  %p621_p10 = scmp.ne.s32.totalorder %s353_s21, %s620_s22  ;;  %p626_p12 = scmp.lt.s32.totalorder %s620_s22, %s620_s22 }
  0x3b   :  { %490 = vmatprep.subr.bf16.mxu0 %v653_v0  ;;  %495 = vmatpush3.bf16.msra.mxu1 %v494_v12  ;;  %v64_v19 = vld [vmem:[#allocation5 + $0x58] sm:$0xff]  ;;  %v66_v22 = vld [vmem:[#allocation5 + $0x68] sm:$0xff]  ;;  %v67_v24 = vld [vmem:[#allocation5 + $0x70] sm:$0xff] }
  0x3c   :  { %496 = vmatprep.subr.bf16.mxu1 %v653_v0  ;;  %v503_v20 = vpack.c.bf16 %v64_v19, %v63_v18  ;;  %v506_v23 = vpack.c.bf16 %v66_v22, %v65_v21  ;;  %v68_v25 = vld [vmem:[#allocation5 + $0x78] sm:$0xff]  ;;  %v69_v27 = vld [vmem:[#allocation5 + $0x80] sm:$0xff]  ;;  %v70_v28 = vld [vmem:[#allocation5 + $0x88] sm:$0xff]  ;;  %vm324_vm2 = vcmp.lt.s32.totalorder %v323_v6, 16  ;;  %vm343_vm3 = vcmp.eq.s32.totalorder %v323_v6, 32  ;;  %p627_p13 = por %p626_p12, %p625_p11 }
  0x3d   :  { %v509_v26 = vpack.c.bf16 %v68_v25, %v67_v24  ;;  %v512_v29 = vpack.c.bf16 %v70_v28, %v69_v27  ;;  %v71_v30 = vld [vmem:[#allocation5 + $0x90] sm:$0xff]  ;;  %v72_v31 = vld [vmem:[#allocation5 + $0x98] sm:$0xff]  ;;  %v73_v33 = vld [vmem:[#allocation5 + $0xa0] sm:$0xff] }
  0x3e   :  { %492 = vmatpush3.bf16.msra.mxu0 %v491_v11  ;;  %v515_v32 = vpack.c.bf16 %v72_v31, %v71_v30  ;;  %v74_v34 = vld [vmem:[#allocation5 + $0xa8] sm:$0xff]  ;;  %v75_v35 = vld [vmem:[#allocation5 + $0xb0] sm:$0xff]  ;;  %v76_v37 = vld [vmem:[#allocation5 + $0xb8] sm:$0xff]  ;;  %p628_p0 = pnand %p627_p13, %p621_p10 }
  0x3f   :  { %517 = vmatprep.subr.bf16.mxu0 %v653_v0  ;;  %498 = vmatpush3.bf16.msra.mxu1 %v497_v13  ;;  %v518_v36 = vpack.c.bf16 %v74_v34, %v73_v33  ;;  %v521_v38 = vpack.c.bf16 %v76_v37, %v75_v35  ;;  %v77_v39 = vld [vmem:[#allocation5 + $0xc0] sm:$0xff]  ;;  %v78_v40 = vld [vmem:[#allocation5 + $0xc8] sm:$0xff]  ;;  %v79_v42 = vld [vmem:[#allocation5 + $0xd0] sm:$0xff] }
  0x40   :  { %499 = vmatprep.subr.bf16.mxu1 %v653_v0  ;;  %v524_v41 = vpack.c.bf16 %v78_v40, %v77_v39  ;;  %v80_v43 = vld [vmem:[#allocation5 + $0xd8] sm:$0xff]  ;;  %v81_v45 = vld [vmem:[#allocation5 + $0xe0] sm:$0xff]  ;;  %v82_v46 = vld [vmem:[#allocation5 + $0xe8] sm:$0xff] }
  0x41   :  { %415 = vmatmul.mubr.msk.f32.vlgmr.msra.gmra.mrb[0].mxu0 %vm97_vm1, %v52_v16  ;;  %v527_v44 = vpack.c.bf16 %v80_v43, %v79_v42  ;;  %v530_v47 = vpack.c.bf16 %v82_v46, %v81_v45  ;;  %v83_v48 = vld [vmem:[#allocation5 + $0xf0] sm:$0xff]  ;;  %v84_v49 = vld [vmem:[#allocation5 + $0xf8] sm:$0xff]  ;;  %v85_v51 = vld [vmem:[#allocation5 + $0x100] sm:$0xff] }
  0x42   :  { %484 = vmatprep.mubr.msk.f32.mxu0 %vm654_vm0, %v655_v1  ;;  %519 = vmatpush3.bf16.msra.mxu0 %v518_v36  ;;  %v533_v50 = vpack.c.bf16 %v84_v49, %v83_v48  ;;  %v86_v52 = vld [vmem:[#allocation5 + $0x108] sm:$0xff]  ;;  %v362_v54 = vld [vmem:[#allocation7] ss:$0 sm:$0xff]  ;;  %v87_v59 = vld [vmem:[#allocation5 + $0x110] sm:$0xff] }
  0x43   :  { %501 = vmatpush3.bf16.msra.mxu1 %v500_v17  ;;  %520 = vmatprep.subr.bf16.mxu0 %v653_v0  ;;  %v536_v53 = vpack.c.bf16 %v86_v52, %v85_v51  ;;  %v88_v60 = vld [vmem:[#allocation5 + $0x118] sm:$0xff]  ;;  %v364_v62 = vld [vmem:[#allocation7 + $0x1] ss:$0 sm:$0xff]  ;;  %v365_v5 = vld [vmem:[#allocation7 + $0x2] ss:$0 sm:$0xff] }
  0x44   :  { %502 = vmatprep.subr.bf16.mxu1 %v653_v0  ;;  %v539_v61 = vpack.c.bf16 %v88_v60, %v87_v59  ;;  %v366_v17 = vld [vmem:[#allocation7 + $0x3] ss:$0 sm:$0xff] }
  0x46   :  { %522 = vmatpush3.bf16.msra.mxu0 %v521_v38 }
  0x47   :  { %504 = vmatpush3.bf16.msra.mxu1 %v503_v20  ;;  %523 = vmatprep.subr.bf16.mxu0 %v653_v0 }
  0x48   :  { %505 = vmatprep.subr.bf16.mxu1 %v653_v0 }
  0x4a   :  { %525 = vmatpush3.bf16.msra.mxu0 %v524_v41 }
  0x4b   :  { %507 = vmatpush3.bf16.msra.mxu1 %v506_v23  ;;  %526 = vmatprep.subr.bf16.mxu0 %v653_v0 }
  0x4c   :  { %508 = vmatprep.subr.bf16.mxu1 %v653_v0 }
  0x4e   :  { %528 = vmatpush3.bf16.msra.mxu0 %v527_v44 }
  0x4f   :  { %510 = vmatpush3.bf16.msra.mxu1 %v509_v26  ;;  %529 = vmatprep.subr.bf16.mxu0 %v653_v0 }
  0x50   :  { %511 = vmatprep.subr.bf16.mxu1 %v653_v0 }
  0x52   :  { %531 = vmatpush3.bf16.msra.mxu0 %v530_v47 }
  0x53   :  { %513 = vmatpush3.bf16.msra.mxu1 %v512_v29  ;;  %532 = vmatprep.subr.bf16.mxu0 %v653_v0 }
  0x54   :  { %514 = vmatprep.subr.bf16.mxu1 %v653_v0 }
  0x56   :  { %534 = vmatpush3.bf16.msra.mxu0 %v533_v50 }
  0x57   :  { %516 = vmatpush3.bf16.msra.mxu1 %v515_v32  ;;  %535 = vmatprep.subr.bf16.mxu0 %v653_v0 }
  0x5a   :  { %537 = vmatpush3.bf16.msra.mxu0 %v536_v53 }
  0x5b   :  { %538 = vmatprep.subr.bf16.mxu0 %v653_v0 }
  0x5e   :  { %540 = vmatpush3.bf16.msra.mxu0 %v539_v61 }
 0x114   :  { %v167_v55 = vpop.f32.mrb[0].mxu0 }
 0x115   :  { %v168_v56 = vadd.f32 %v362_v54, %v167_v55  ;;  %v416_v57 = vpop.f32.mrb[1].mxu0 }
 0x117   :  { %v171_v58 = vmax.f32 %v168_v56, 0.0 }
 0x119   :  { %450 = vmatmul.mubr.f32.vlgmr.msra.gmra.mrb[0].mxu1 %v171_v58 }
 0x1ec   :  { %v242_v63 = vpop.f32.mrb[0].mxu1 }
 0x1ed   :  { %v243_v1 = vadd.f32 %v364_v62, %v242_v63  ;;  %v451_v2 = vpop.f32.mrb[1].mxu1 }
 0x1ef   :  { %v246_v3 = vmax.f32 %v243_v1, 0.0 }
 0x1f1   :  { %485 = vmatmul.mubr.f32.vlgmr.msra.gmra.mrb[2].mxu0 %v246_v3 }
 0x2c4   :  { %v317_v0 = vpop.f32.mrb[2].mxu0 }
 0x2c5   :  { %v318_v7 = vadd.f32 %v365_v5, %v317_v0  ;;  %v486_v8 = vpop.f32.mrb[3].mxu0 }
 0x2c7   :  { %v321_v9 = vmax.f32 %v318_v7, 0.0 }
 0x2c9   :  { %v325_v10 = vsel %vm324_vm2, %v321_v9, -1e+30 }
 0x2ca   :  { %326 = vmax.xlane.f32.xlu0 %v325_v10 }
 0x357   :  { %v327_v11 = vpop.xlane.xlu0 %326 }
 0x358   :  { %v328_v12 = vsub.f32 %v325_v10, %v327_v11 }
 0x35a   :  { %v329_v13 = vmul.f32 1.442695, %v328_v12 }
 0x35c   :  { %550 = vpow2.f32 %v329_v13 }
 0x366   :  { %v551_v14 = vpop.eup %550 }
 0x367   :  { %331 = vadd.xlane.f32.xlu0 %v551_v14 }
 0x3f4   :  { %v332_v15 = vpop.xlane.xlu0 %331 }
 0x3f5   :  { %552 = vrcp.f32 %v332_v15 }
 0x3ff   :  { %v553_v16 = vpop.eup %552 }
 0x400   :  { %v334_v18 = vmul.f32 %v553_v16, %v551_v14 }
 0x402   :  { %v339_v19 = vmul.f32 %v366_v17, %v334_v18 }
 0x404   :  { %340 = vadd.xlane.f32.xlu1 %v339_v19 }
 0x491   :  { %v341_v20 = vpop.xlane.xlu1 %340 }
 0x492   :  { %v342_v21 = vadd.f32 %v341_v20, %v168_v56 }
 0x494   :  { %v344_v22 = vsel %vm343_vm3, %v342_v21, %v334_v18 }
 0x495   :  { %345 = vst [vmem:[#allocation8] sm:$0xff] %v344_v22 }
 0x496   :  { %631 = shalt.err (!%p628_p0)
}
 0x497   :  { %s632_s25 = scalar_lea.hbm %s749_s3, 128 }
 0x498   :  { %p633_p1 = scmp.ne.s32.totalorder %s749_s3, %s632_s25  ;;  %p636_p2 = scmp.lt.u32.totalorder %s632_s25, %s749_s3 }
 0x49a   :  { %p638_p3 = pnand %p636_p2, %p633_p1 }
 0x49c   :  { %641 = shalt.err (!%p638_p3)
}
 0x49d   :  { %355 = dma.vmem_to_hbm [thread:$0]  %s353_s21, 128, %s749_s3, [#allocation4]  }
 0x49e   :  { %646 = dma.done.wait [#allocation4], 128  }
 0x49f   :  { %647 = vsyncadd [#allocation4], 4294967168 }
 0x4a0   :  { %359 = vsyncpa [#allocation3], 1 }
 0x4a1   :  { %360 = vsyncpa [#allocation6], 1 }
 0x4a2   :  { %361 = vsyncpa [#allocation4], 1 }

</bundles_post_ra>
